<compile_context>
chip_gen: v7x
topology: tpu7x:2x2x1
jax: 0.10.0
libtpu: 0.0.40
codegen_flags: <defaults>
</compile_context>

<pallas_src>
import jax
import jax.numpy as jnp
from jax.experimental import pallas as pl
from jax.experimental.pallas import tpu as pltpu


IN_FEATURES = 400
HIDDEN = 300
OUT_FEATURES = 10

HIDDEN_PAD = 384   # 3 * 128, lane-aligned hidden width
OUT_PAD = 128      # lane-dense output width (sliced back to 10 in the wrapper)


def _round_up(x, m):
    return ((x + m - 1) // m) * m


def _mlp_kernel(x_ref, w1_ref, b1_ref, w2_ref, b2_ref, o_ref):
    # fc1: bf16 MXU matmul, f32 accumulate.
    h = jnp.dot(x_ref[...], w1_ref[...], preferred_element_type=jnp.float32)
    # Bias-add + ReLU in f32 on the VPU; b1 is (1, HIDDEN_PAD), broadcast over rows.
    h = jnp.maximum(h + b1_ref[...], 0.0)
    # fc2: cast activations back to bf16 for the MXU, accumulate in f32.
    y = jnp.dot(h.astype(jnp.bfloat16), w2_ref[...],
                preferred_element_type=jnp.float32)
    o_ref[...] = (y + b2_ref[...]).astype(o_ref.dtype)


def one_fcmnn_forward(x, w1, b1, w2, b2, *, tm=1024):
    """Forward pass of OneFCMNN.

    x: (N, ...) with prod(dims[1:]) == 400 (e.g. NCHW (N, 1, 20, 20)).
    w1: (400, 300), b1: (300,), w2: (300, 10), b2: (10,)  -- weights stored
    (in_features, out_features), i.e. transposed vs. nn.Linear's (out, in).
    Returns (N, 10) float32 logits.
    """
    n = x.shape[0]
    x2d = x.reshape(n, -1)
    assert x2d.shape[1] == IN_FEATURES

    # --- Pad weights/biases to lane-aligned shapes (zero pads are inert) ---
    w1p = jnp.zeros((IN_FEATURES, HIDDEN_PAD), jnp.bfloat16)
    w1p = w1p.at[:, :HIDDEN].set(w1.astype(jnp.bfloat16))
    b1p = jnp.zeros((1, HIDDEN_PAD), jnp.float32)
    b1p = b1p.at[:, :HIDDEN].set(b1.astype(jnp.float32))
    w2p = jnp.zeros((HIDDEN_PAD, OUT_PAD), jnp.bfloat16)
    w2p = w2p.at[:HIDDEN, :OUT_FEATURES].set(w2.astype(jnp.bfloat16))
    b2p = jnp.zeros((1, OUT_PAD), jnp.float32)
    b2p = b2p.at[:, :OUT_FEATURES].set(b2.astype(jnp.float32))

    # --- Batch tiling: pick TM, pad N up to a multiple of it ---
    tm = min(tm, _round_up(n, 8))
    n_pad = _round_up(n, tm)
    x_p = jnp.zeros((n_pad, IN_FEATURES), jnp.bfloat16)
    x_p = x_p.at[:n].set(x2d.astype(jnp.bfloat16))

    grid = (n_pad // tm,)
    out = pl.pallas_call(
        _mlp_kernel,
        out_shape=jax.ShapeDtypeStruct((n_pad, OUT_PAD), jnp.float32),
        grid=grid,
        in_specs=[
            # x tile marches over the batch; double-buffered by the pipeline.
            pl.BlockSpec((tm, IN_FEATURES), lambda i: (i, 0)),
            # Weights/biases: constant index_map -> VMEM-resident, no re-DMA.
            pl.BlockSpec((IN_FEATURES, HIDDEN_PAD), lambda i: (0, 0)),
            pl.BlockSpec((1, HIDDEN_PAD), lambda i: (0, 0)),
            pl.BlockSpec((HIDDEN_PAD, OUT_PAD), lambda i: (0, 0)),
            pl.BlockSpec((1, OUT_PAD), lambda i: (0, 0)),
        ],
        out_specs=pl.BlockSpec((tm, OUT_PAD), lambda i: (i, 0)),
        compiler_params=pltpu.CompilerParams(
            dimension_semantics=("parallel",)),
    )(x_p, w1p, b1p, w2p, b2p)

    return out[:n, :OUT_FEATURES]


def init_params(key):
    """Deterministic init mimicking torch.nn.Linear default (uniform +-1/sqrt(fan_in)).

    Weights are stored (in_features, out_features) for the kernel layout.
    """
    k1, k2, k3, k4 = jax.random.split(key, 4)
    bound1 = 1.0 / jnp.sqrt(IN_FEATURES)
    bound2 = 1.0 / jnp.sqrt(HIDDEN)
    w1 = jax.random.uniform(k1, (IN_FEATURES, HIDDEN), jnp.float32, -bound1, bound1)
    b1 = jax.random.uniform(k2, (HIDDEN,), jnp.float32, -bound1, bound1)
    w2 = jax.random.uniform(k3, (HIDDEN, OUT_FEATURES), jnp.float32, -bound2, bound2)
    b2 = jax.random.uniform(k4, (OUT_FEATURES,), jnp.float32, -bound2, bound2)
    return w1, b1, w2, b2


if __name__ == "__main__":
    key = jax.random.PRNGKey(0)
    kx, kp = jax.random.split(key)

    # NCHW input: batch=2, 1 channel, 20x20 spatial -> 400 flat features.
    x = jax.random.normal(kx, (2, 1, 20, 20), jnp.float32)
    w1, b1, w2, b2 = init_params(kp)

    out = one_fcmnn_forward(x, w1, b1, w2, b2)
    out = jax.block_until_ready(out)

    # Sanity check against a pure-JAX f32 reference of the same forward pass
    # (tolerance covers bf16 MXU inputs with f32 accumulation).
    x2d = x.reshape(x.shape[0], -1)
    ref = jnp.maximum(x2d @ w1 + b1, 0.0) @ w2 + b2
    assert out.shape == (2, OUT_FEATURES)
    assert jnp.allclose(out, ref, atol=5e-2, rtol=5e-2), (
        f"max abs diff = {jnp.max(jnp.abs(out - ref))}")

    print("KERNEL_OK")
</pallas_src>

<mosaic_0001>
module attributes {stable_mosaic.version = 11 : i64} {
  func.func @_mlp_kernel(%arg0: i32, %arg1: memref<8x400xbf16, #tpu.memory_space<vmem>>, %arg2: memref<400x384xbf16, #tpu.memory_space<vmem>>, %arg3: memref<1x384xf32, #tpu.memory_space<vmem>>, %arg4: memref<384x128xbf16, #tpu.memory_space<vmem>>, %arg5: memref<1x128xf32, #tpu.memory_space<vmem>>, %arg6: memref<8x128xf32, #tpu.memory_space<vmem>>) attributes {dimension_semantics = [#tpu.dimension_semantics<parallel>], iteration_bounds = array<i64: 1>, scalar_prefetch = 0 : i64, scratch_operands = 0 : i64, tpu.core_type = #tpu.core_type<tc>, window_params = [{transform_indices = @transform_0, window_bounds = array<i64: 8, 400>}, {pipeline_mode = #tpu.pipeline_mode<synchronous>, transform_indices = @transform_1, window_bounds = array<i64: 400, 384>}, {pipeline_mode = #tpu.pipeline_mode<synchronous>, transform_indices = @transform_2, window_bounds = array<i64: 1, 384>}, {pipeline_mode = #tpu.pipeline_mode<synchronous>, transform_indices = @transform_3, window_bounds = array<i64: 384, 128>}, {pipeline_mode = #tpu.pipeline_mode<synchronous>, transform_indices = @transform_4, window_bounds = array<i64: 1, 128>}, {transform_indices = @transform_5, window_bounds = array<i64: 8, 128>}]} {
    %c0 = arith.constant 0 : index
    %c0_0 = arith.constant 0 : index
    %0 = vector.load %arg1[%c0, %c0_0] : memref<8x400xbf16, #tpu.memory_space<vmem>>, vector<8x400xbf16>
    %c0_1 = arith.constant 0 : index
    %c0_2 = arith.constant 0 : index
    %1 = vector.load %arg2[%c0_1, %c0_2] : memref<400x384xbf16, #tpu.memory_space<vmem>>, vector<400x384xbf16>
    %cst = arith.constant dense<0.000000e+00> : vector<8x384xf32>
    %2 = tpu.matmul %0, %1, %cst {dimension_numbers = #tpu.dot_dimension_numbers<[1], [0], [0], [1], [0, 0, 1, 1], [], []>} : vector<8x400xbf16>, vector<400x384xbf16>, vector<8x384xf32> -> vector<8x384xf32>
    %c0_3 = arith.constant 0 : index
    %c0_4 = arith.constant 0 : index
    %3 = vector.load %arg3[%c0_3, %c0_4] : memref<1x384xf32, #tpu.memory_space<vmem>>, vector<1x384xf32>
    %4 = vector.broadcast %3 : vector<1x384xf32> to vector<8x384xf32>
    %5 = arith.addf %2, %4 : vector<8x384xf32>
    %cst_5 = arith.constant 0.000000e+00 : f32
    %6 = vector.broadcast %cst_5 : f32 to vector<8x384xf32>
    %7 = arith.maximumf %5, %6 : vector<8x384xf32>
    %8 = arith.truncf %7 : vector<8x384xf32> to vector<8x384xbf16>
    %c0_6 = arith.constant 0 : index
    %c0_7 = arith.constant 0 : index
    %9 = vector.load %arg4[%c0_6, %c0_7] : memref<384x128xbf16, #tpu.memory_space<vmem>>, vector<384x128xbf16>
    %cst_8 = arith.constant dense<0.000000e+00> : vector<8x128xf32>
    %10 = tpu.matmul %8, %9, %cst_8 {dimension_numbers = #tpu.dot_dimension_numbers<[1], [0], [0], [1], [0, 0, 1, 1], [], []>} : vector<8x384xbf16>, vector<384x128xbf16>, vector<8x128xf32> -> vector<8x128xf32>
    %c0_9 = arith.constant 0 : index
    %c0_10 = arith.constant 0 : index
    %11 = vector.load %arg5[%c0_9, %c0_10] : memref<1x128xf32, #tpu.memory_space<vmem>>, vector<1x128xf32>
    %12 = vector.broadcast %11 : vector<1x128xf32> to vector<8x128xf32>
    %13 = arith.addf %10, %12 : vector<8x128xf32>
    %c0_11 = arith.constant 0 : index
    %c0_12 = arith.constant 0 : index
    %14 = vector.load %arg6[%c0_11, %c0_12] : memref<8x128xf32, #tpu.memory_space<vmem>>, vector<8x128xf32>
    tpu.vector_store %arg6[%c0_11, %c0_12], %13 {strides = array<i32>} : memref<8x128xf32, #tpu.memory_space<vmem>>, vector<8x128xf32>,
    return
  }
  func.func @transform_0(%arg0: i32) -> (i32, i32) {
    %c0_i32 = arith.constant 0 : i32
    %c0_i32_0 = arith.constant 0 : i32
    return %arg0, %c0_i32 : i32, i32
  }
  func.func @transform_1(%arg0: i32) -> (i32, i32) {
    %c0_i32 = arith.constant 0 : i32
    %c0_i32_0 = arith.constant 0 : i32
    %c0_i32_1 = arith.constant 0 : i32
    return %c0_i32, %c0_i32_0 : i32, i32
  }
  func.func @transform_2(%arg0: i32) -> (i32, i32) {
    %c0_i32 = arith.constant 0 : i32
    %c0_i32_0 = arith.constant 0 : i32
    %c0_i32_1 = arith.constant 0 : i32
    return %c0_i32, %c0_i32_0 : i32, i32
  }
  func.func @transform_3(%arg0: i32) -> (i32, i32) {
    %c0_i32 = arith.constant 0 : i32
    %c0_i32_0 = arith.constant 0 : i32
    %c0_i32_1 = arith.constant 0 : i32
    return %c0_i32, %c0_i32_0 : i32, i32
  }
  func.func @transform_4(%arg0: i32) -> (i32, i32) {
    %c0_i32 = arith.constant 0 : i32
    %c0_i32_0 = arith.constant 0 : i32
    %c0_i32_1 = arith.constant 0 : i32
    return %c0_i32, %c0_i32_0 : i32, i32
  }
  func.func @transform_5(%arg0: i32) -> (i32, i32) {
    %c0_i32 = arith.constant 0 : i32
    %c0_i32_0 = arith.constant 0 : i32
    return %arg0, %c0_i32 : i32, i32
  }
}

</mosaic_0001>

<bundles_post_ra>
// kernel: tpu_custom_call.1
= control target key start
LH: loop header
LB: loop body
LE: loop exit
PB: predicated region body
PF: predicated region fallthrough
CT: control target
= control target key end

     0   :  { %10 = vsyncpa [#allocation3], 0  ;;  %s1589_s0 = inlined_call_operand.hbm [shape: bf16[8,400], index: 0, kind: input, shape index: {}]   ;;  %s1590_s1 = inlined_call_operand.hbm [shape: bf16[400,384], index: 1, kind: input, shape index: {}]   ;;  %s1591_s2 = inlined_call_operand.vmem [shape: f32[1,384], index: 2, kind: input, shape index: {}]   ;;  %s1592_s3 = inlined_call_operand.hbm [shape: bf16[384,128], index: 3, kind: input, shape index: {}]   ;;  %s1593_s4 = inlined_call_operand.vmem [shape: f32[1,128], index: 4, kind: input, shape index: {}]   ;;  %s1594_s5 = inlined_call_operand.hbm [shape: f32[8,128], index: 5, kind: output, shape index: {}]  }
   0x1   :  { %11 = vsyncpa [#allocation6], 0 }
   0x2   :  { %12 = vsyncpa [#allocation4], 0  ;;  %s1479_s18 = smov [#allocation5]   ;;  %s1385_s22 = scalar_lea.hbm %s1590_s1, 9600 }
   0x3   :  { %s28_s19 = sshll.u32 %s1479_s18, 4  ;;  %p1386_p0 = scmp.ne.s32.totalorder %s1590_s1, %s1385_s22  ;;  %s29_s19 = int_to_ptr.vmem [resolvable:$true] %s28_s19 }
   0x4   :  { %p1389_p1 = scmp.lt.u32.totalorder %s1385_s22, %s1590_s1 }
   0x6   :  { %p1391_p2 = pnand %p1389_p1, %p1386_p0 }
   0x8   :  { %1394 = shalt.err (!%p1391_p2)
}
   0x9   :  { %s1395_s27 = scalar_lea.vmem %s29_s19, 9600  ;;  %p1400_p4 = scmp.lt.s32.totalorder %s29_s19, %s29_s19 }
   0xa   :  { %p1396_p3 = scmp.ne.s32.totalorder %s29_s19, %s1395_s27  ;;  %p1401_p5 = scmp.lt.s32.totalorder %s1395_s27, %s1395_s27 }
   0xc   :  { %p1402_p6 = por %p1401_p5, %p1400_p4 }
   0xe   :  { %p1403_p7 = pnand %p1402_p6, %p1396_p3 }
  0x10   :  { %1406 = shalt.err (!%p1403_p7)
}
  0x11   :  { %s1480_s28 = smov 192   ;;  %s1481_s29 = smov 12  }
  0x12   :  { %34 = dma.hbm_to_vmem [thread:$0]  %s1590_s1, 9600, %s29_s19, [#allocation6], %s1480_s28, %s1480_s28, %s1481_s29  }
  0x13   :  { %s1482_s7 = smov [#allocation2]   ;;  %s1483_s9 = smov [#allocation7]  }
  0x14   :  { %s19_s8 = sshll.u32 %s1482_s7, 4  ;;  %s42_s10 = sshll.u32 %s1483_s9, 4  ;;  %s20_s8 = int_to_ptr.vmem [resolvable:$true] %s19_s8  ;;  %s43_s10 = int_to_ptr.vmem [resolvable:$true] %s42_s10 }
  0x15   :  { %s1407_s13 = scalar_lea.hbm %s1589_s0, 256 }
  0x16   :  { %p1408_p8 = scmp.ne.s32.totalorder %s1589_s0, %s1407_s13  ;;  %p1411_p9 = scmp.lt.u32.totalorder %s1407_s13, %s1589_s0 }
  0x18   :  { %p1413_p10 = pnand %p1411_p9, %p1408_p8 }
  0x1a   :  { %1416 = shalt.err (!%p1413_p10)
}
  0x1b   :  { %s1417_s1 = scalar_lea.vmem %s20_s8, 256  ;;  %p1422_p12 = scmp.lt.s32.totalorder %s20_s8, %s20_s8 }
  0x1c   :  { %p1418_p11 = scmp.ne.s32.totalorder %s20_s8, %s1417_s1  ;;  %p1423_p13 = scmp.lt.s32.totalorder %s1417_s1, %s1417_s1 }
  0x1e   :  { %p1424_p0 = por %p1423_p13, %p1422_p12 }
  0x20   :  { %p1425_p1 = pnand %p1424_p0, %p1418_p11 }
  0x22   :  { %1428 = shalt.err (!%p1425_p1)
}
  0x23   :  { %22 = dma.hbm_to_vmem [thread:$0]  %s1589_s0, 256, %s20_s8, [#allocation3]  }
  0x24   :  { %s1429_s22 = scalar_lea.hbm %s1592_s3, 3072 }
  0x25   :  { %p1430_p2 = scmp.ne.s32.totalorder %s1592_s3, %s1429_s22  ;;  %p1433_p3 = scmp.lt.u32.totalorder %s1429_s22, %s1592_s3 }
  0x27   :  { %p1435_p4 = pnand %p1433_p3, %p1430_p2 }
  0x29   :  { %1438 = shalt.err (!%p1435_p4)
}
  0x2a   :  { %s1439_s27 = scalar_lea.vmem %s43_s10, 3072  ;;  %p1444_p6 = scmp.lt.s32.totalorder %s43_s10, %s43_s10 }
  0x2b   :  { %p1440_p5 = scmp.ne.s32.totalorder %s43_s10, %s1439_s27  ;;  %p1445_p7 = scmp.lt.s32.totalorder %s1439_s27, %s1439_s27 }
  0x2d   :  { %p1446_p8 = por %p1445_p7, %p1444_p6 }
  0x2f   :  { %p1447_p9 = pnand %p1446_p8, %p1440_p5 }
  0x31   :  { %1450 = shalt.err (!%p1447_p9)
}
  0x32   :  { %s1484_s0 = smov 64   ;;  %s1485_s28 = smov 4  }
  0x33   :  { %48 = dma.hbm_to_vmem [thread:$0]  %s1592_s3, 3072, %s43_s10, [#allocation6], %s1484_s0, %s1484_s0, %s1485_s28  }
  0x34   :  { %1473 = dma.done.wait [#allocation3], 256  }
  0x35   :  { %1474 = vsyncadd [#allocation3], 4294967040 }
  0x36   :  { %1475 = dma.done.wait [#allocation6], 12672  }
  0x37   :  { %1476 = vsyncadd [#allocation6], 4294954624  ;;  %v1257_v0 = vld [vmem:[#allocation5 + $0x4] ss:$12 sps:$4 sm:$0xff]   ;;  %v1259_v1 = vld [vmem:[#allocation5] ss:$12 sps:$4 sm:$0xff]  }
  0x38   :  { %597 = vmatprep.subr.bf16.mxu0 %v1257_v0  ;;  %v1260_v2 = vld [vmem:[#allocation5 + $0x1c] ss:$12 sps:$4 sm:$0xff]   ;;  %v1262_v3 = vld [vmem:[#allocation5 + $0x18] ss:$12 sps:$4 sm:$0xff]   ;;  %v1265_v6 = vld [vmem:[#allocation5 + $0x34] ss:$12 sps:$4 sm:$0xff]  }
  0x39   :  { %598 = vmatpush1.bf16.msra.mxu0 %v1259_v1  ;;  %v1263_v4 = vld [vmem:[#allocation5 + $0xc8] ss:$12 sps:$4 sm:$0xff]   ;;  %v1267_v7 = vld [vmem:[#allocation5 + $0x30] ss:$12 sps:$4 sm:$0xff]   ;;  %v1268_v8 = vld [vmem:[#allocation5 + $0xe0] ss:$12 sps:$4 sm:$0xff]  }
  0x3a   :  { %599 = vmatprep.subr.bf16.mxu0 %v1260_v2  ;;  %v1264_v5 = vld [vmem:[#allocation5 + $0x8] ss:$12 sps:$4 sm:$0xff]   ;;  %1167 = vmatprep.subr.bf16.mxu1 %v1263_v4  ;;  %v1269_v9 = vld [vmem:[#allocation5 + $0x20] ss:$12 sps:$4 sm:$0xff]   ;;  %v1273_v12 = vld [vmem:[#allocation5 + $0xf8] ss:$12 sps:$4 sm:$0xff]  }
  0x3b   :  { %1168 = vmatpush3.bf16.msra.mxu1 %v1264_v5  ;;  %v1270_v10 = vld [vmem:[#allocation5 + $0x4c] ss:$12 sps:$4 sm:$0xff]   ;;  %v1272_v11 = vld [vmem:[#allocation5 + $0x48] ss:$12 sps:$4 sm:$0xff]   ;;  %v1275_v14 = vld [vmem:[#allocation5 + $0x64] ss:$12 sps:$4 sm:$0xff]  }
  0x3c   :  { %1169 = vmatprep.subr.bf16.mxu1 %v1268_v8  ;;  %v1274_v13 = vld [vmem:[#allocation5 + $0x38] ss:$12 sps:$4 sm:$0xff]   ;;  %v1278_v15 = vld [vmem:[#allocation5 + $0x110] ss:$12 sps:$4 sm:$0xff]   ;;  %v1277_v17 = vld [vmem:[#allocation5 + $0x60] ss:$12 sps:$4 sm:$0xff]  }
  0x3d   :  { %600 = vmatpush1.bf16.msra.mxu0 %v1262_v3  ;;  %v1279_v16 = vld [vmem:[#allocation5 + $0x50] ss:$12 sps:$4 sm:$0xff]   ;;  %v1283_v19 = vld [vmem:[#allocation5 + $0x128] ss:$12 sps:$4 sm:$0xff]   ;;  %v1282_v20 = vld [vmem:[#allocation5 + $0x78] ss:$12 sps:$4 sm:$0xff]  }
  0x3e   :  { %601 = vmatprep.subr.bf16.mxu0 %v1265_v6  ;;  %v1280_v18 = vld [vmem:[#allocation5 + $0x7c] ss:$12 sps:$4 sm:$0xff]   ;;  %v1285_v22 = vld [vmem:[#allocation5 + $0x94] ss:$12 sps:$4 sm:$0xff]   ;;  %v1293_v26 = vld [vmem:[#allocation5 + $0x158] ss:$12 sps:$4 sm:$0xff]  }
  0x3f   :  { %1170 = vmatpush3.bf16.msra.mxu1 %v1269_v9  ;;  %v1284_v21 = vld [vmem:[#allocation5 + $0x68] ss:$12 sps:$4 sm:$0xff]   ;;  %v1288_v23 = vld [vmem:[#allocation5 + $0x140] ss:$12 sps:$4 sm:$0xff]   ;;  %v1287_v24 = vld [vmem:[#allocation5 + $0x90] ss:$12 sps:$4 sm:$0xff]  }
  0x40   :  { %1171 = vmatprep.subr.bf16.mxu1 %v1273_v12  ;;  %v1289_v25 = vld [vmem:[#allocation5 + $0x80] ss:$12 sps:$4 sm:$0xff]   ;;  %v1292_v28 = vld [vmem:[#allocation5 + $0xa8] ss:$12 sps:$4 sm:$0xff]   ;;  %v1294_v29 = vld [vmem:[#allocation5 + $0x98] ss:$12 sps:$4 sm:$0xff]  }
  0x41   :  { %602 = vmatpush1.bf16.msra.mxu0 %v1267_v7  ;;  %v1290_v27 = vld [vmem:[#allocation5 + $0xac] ss:$12 sps:$4 sm:$0xff]   ;;  %v1298_v30 = vld [vmem:[#allocation5 + $0x170] ss:$12 sps:$4 sm:$0xff]   ;;  %v1305_v38 = vld [vmem:[#allocation5 + $0x188] ss:$12 sps:$4 sm:$0xff]  }
  0x42   :  { %603 = vmatprep.subr.bf16.mxu0 %v1270_v10  ;;  %v1295_v31 = vld [vmem:[#allocation5 + $0xc4] ss:$12 sps:$4 sm:$0xff]   ;;  %v1297_v35 = vld [vmem:[#allocation5 + $0xc0] ss:$12 sps:$4 sm:$0xff]   ;;  %v1300_v36 = vld [vmem:[#allocation5 + $0xdc] ss:$12 sps:$4 sm:$0xff]  }
  0x43   :  { %1172 = vmatpush3.bf16.msra.mxu1 %v1274_v13  ;;  %v61_v32 = vld [vmem:[#allocation2] sm:$0xff]  ;;  %v1302_v39 = vld [vmem:[#allocation5 + $0xd8] ss:$12 sps:$4 sm:$0xff]   ;;  %v1486_v40 = vmov 0   ;;  %v1309_v42 = vld [vmem:[#allocation5 + $0x1a0] ss:$12 sps:$4 sm:$0xff]  }
  0x44   :  { %1173 = vmatprep.subr.bf16.mxu1 %v1278_v15  ;;  %v1299_v33 = vld [vmem:[#allocation5 + $0xb0] ss:$12 sps:$4 sm:$0xff]   ;;  %v1062_v34 = vcombine.high %v61_v32, %v61_v32  ;;  %v1556_v37 = vcombine.low %v61_v32, %v61_v32  ;;  %v1306_v41 = vld [vmem:[#allocation5 + $0xf4] ss:$12 sps:$4 sm:$0xff]   ;;  %v1310_v44 = vld [vmem:[#allocation5 + $0x10c] ss:$12 sps:$4 sm:$0xff]  }
  0x45   :  { %604 = vmatpush1.bf16.msra.mxu0 %v1272_v11  ;;  %v1308_v43 = vld [vmem:[#allocation5 + $0xf0] ss:$12 sps:$4 sm:$0xff]   ;;  %v1313_v45 = vld [vmem:[#allocation5 + $0x1b8] ss:$12 sps:$4 sm:$0xff]   ;;  %v1312_v46 = vld [vmem:[#allocation5 + $0x108] ss:$12 sps:$4 sm:$0xff]  }
  0x46   :  { %605 = vmatprep.subr.bf16.mxu0 %v1275_v14  ;;  %711 = vmatprep.mubr.bf16.mxu1 %v1062_v34  ;;  %v1314_v47 = vld [vmem:[#allocation5 + $0x124] ss:$12 sps:$4 sm:$0xff]   ;;  %v1316_v49 = vld [vmem:[#allocation5 + $0x120] ss:$12 sps:$4 sm:$0xff]   ;;  %v1318_v50 = vld [vmem:[#allocation5 + $0x13c] ss:$12 sps:$4 sm:$0xff]  }
  0x47   :  { %1174 = vmatpush3.bf16.msra.mxu1 %v1279_v16  ;;  %629 = vmatprep.mubr.bf16.mxu0 %v1062_v34  ;;  %v1317_v48 = vld [vmem:[#allocation5 + $0x1d0] ss:$12 sps:$4 sm:$0xff]   ;;  %v1321_v51 = vld [vmem:[#allocation5 + $0x1e8] ss:$12 sps:$4 sm:$0xff]   ;;  %vm593_vm0 = vcmask 130048   ;;  %vm1488_vm1 = vmmov 0  }
  0x48   :  { %1175 = vmatprep.subr.bf16.mxu1 %v1283_v19  ;;  %v62_v52 = vld [vmem:[#allocation2 + $0x8] sm:$0xff]  ;;  %v1322_v55 = vld [vmem:[#allocation5 + $0x154] ss:$12 sps:$4 sm:$0xff]   ;;  %v1332_v61 = vld [vmem:[#allocation5 + $0x184] ss:$12 sps:$4 sm:$0xff]   ;;  %v1487_v19 = vmov 0.0  }
  0x49   :  { %606 = vmatpush1.bf16.msra.mxu0 %v1277_v17  ;;  %v1320_v53 = vld [vmem:[#allocation5 + $0x138] ss:$12 sps:$4 sm:$0xff]   ;;  %v1064_v54 = vcombine.high %v62_v52, %v62_v52  ;;  %v1325_v56 = vld [vmem:[#allocation5 + $0x200] ss:$12 sps:$4 sm:$0xff]   ;;  %v1324_v57 = vld [vmem:[#allocation5 + $0x150] ss:$12 sps:$4 sm:$0xff]   ;;  %v1063_v5 = vcombine.low %v62_v52, %v62_v52 }
  0x4a   :  { %607 = vmatprep.subr.bf16.mxu0 %v1280_v18  ;;  %v1326_v58 = vld [vmem:[#allocation5 + $0x16c] ss:$12 sps:$4 sm:$0xff]   ;;  %v1328_v60 = vld [vmem:[#allocation5 + $0x168] ss:$12 sps:$4 sm:$0xff]   ;;  %v1333_v63 = vld [vmem:[#allocation5 + $0x230] ss:$12 sps:$4 sm:$0xff]  }
  0x4b   :  { %1176 = vmatpush3.bf16.msra.mxu1 %v1284_v21  ;;  %v1329_v59 = vld [vmem:[#allocation5 + $0x218] ss:$12 sps:$4 sm:$0xff]   ;;  %v1330_v62 = vld [vmem:[#allocation5 + $0x180] ss:$12 sps:$4 sm:$0xff]   ;;  %v1336_v0 = vld [vmem:[#allocation5 + $0x19c] ss:$12 sps:$4 sm:$0xff]  }
  0x4c   :  { %1177 = vmatprep.subr.bf16.mxu1 %v1288_v23  ;;  %v1337_v1 = vld [vmem:[#allocation5 + $0x248] ss:$12 sps:$4 sm:$0xff]   ;;  %v1334_v2 = vld [vmem:[#allocation5 + $0x198] ss:$12 sps:$4 sm:$0xff]   ;;  %v1338_v4 = vld [vmem:[#allocation5 + $0x1b0] ss:$12 sps:$4 sm:$0xff]  }
  0x4d   :  { %608 = vmatpush1.bf16.msra.mxu0 %v1282_v20  ;;  %v1340_v3 = vld [vmem:[#allocation5 + $0x1b4] ss:$12 sps:$4 sm:$0xff]   ;;  %v1345_v6 = vld [vmem:[#allocation5 + $0x1cc] ss:$12 sps:$4 sm:$0xff]   ;;  %v1348_v8 = vld [vmem:[#allocation5 + $0x1e4] ss:$12 sps:$4 sm:$0xff]  }
  0x4e   :  { %609 = vmatprep.subr.bf16.mxu0 %v1285_v22  ;;  %v1343_v7 = vld [vmem:[#allocation5 + $0x1c8] ss:$12 sps:$4 sm:$0xff]   ;;  %v1346_v9 = vld [vmem:[#allocation5 + $0x1e0] ss:$12 sps:$4 sm:$0xff]   ;;  %v1349_v11 = vld [vmem:[#allocation5 + $0x1f8] ss:$12 sps:$4 sm:$0xff]  }
  0x4f   :  { %1178 = vmatpush3.bf16.msra.mxu1 %v1289_v25  ;;  %v1351_v10 = vld [vmem:[#allocation5 + $0x1fc] ss:$12 sps:$4 sm:$0xff]   ;;  %v1354_v12 = vld [vmem:[#allocation5 + $0x214] ss:$12 sps:$4 sm:$0xff]   ;;  %v1357_v14 = vld [vmem:[#allocation5 + $0x22c] ss:$12 sps:$4 sm:$0xff]  }
  0x50   :  { %1179 = vmatprep.subr.bf16.mxu1 %v1293_v26  ;;  %v1352_v13 = vld [vmem:[#allocation5 + $0x210] ss:$12 sps:$4 sm:$0xff]   ;;  %v1355_v15 = vld [vmem:[#allocation5 + $0x228] ss:$12 sps:$4 sm:$0xff]   ;;  %v1358_v17 = vld [vmem:[#allocation5 + $0x240] ss:$12 sps:$4 sm:$0xff]  }
  0x51   :  { %610 = vmatpush1.bf16.msra.mxu0 %v1287_v24  ;;  %v1360_v16 = vld [vmem:[#allocation5 + $0x244] ss:$12 sps:$4 sm:$0xff]   ;;  %v1361_v18 = vld [vmem:[#allocation7 + $0x80] sm:$0xff]   ;;  %v1363_v21 = vld [vmem:[#allocation7 + $0x90] sm:$0xff]   ;;  %s1489_s8 = smov [#allocation8]  }
  0x52   :  { %611 = vmatprep.subr.bf16.mxu0 %v1290_v27  ;;  %v1362_v20 = vld [vmem:[#allocation7 + $0x88] sm:$0xff]   ;;  %v1364_v22 = vld [vmem:[#allocation7 + $0x98] sm:$0xff]   ;;  %v1365_v23 = vld [vmem:[#allocation7 + $0xa0] sm:$0xff]   ;;  %s1051_s9 = sshll.u32 %s1489_s8, 4  ;;  %s1052_s9 = int_to_ptr.vmem [resolvable:$true] %s1051_s9 }
  0x53   :  { %1180 = vmatpush3.bf16.msra.mxu1 %v1294_v29  ;;  %v1366_v24 = vld [vmem:[#allocation7 + $0xa8] sm:$0xff]   ;;  %v1367_v25 = vld [vmem:[#allocation7 + $0xb0] sm:$0xff]   ;;  %v1368_v26 = vld [vmem:[#allocation7 + $0x40] sm:$0xff]   ;;  %s1451_s10 = scalar_lea.vmem %s1052_s9, 128  ;;  %p1456_p11 = scmp.lt.s32.totalorder %s1052_s9, %s1052_s9 }
  0x54   :  { %1181 = vmatprep.subr.bf16.mxu1 %v1298_v30  ;;  %v1369_v27 = vld [vmem:[#allocation7 + $0xb8] sm:$0xff]   ;;  %v1371_v29 = vld [vmem:[#allocation7 + $0x48] sm:$0xff]   ;;  %v1374_v32 = vld [vmem:[#allocation7 + $0x10] sm:$0xff]   ;;  %p1452_p10 = scmp.ne.s32.totalorder %s1052_s9, %s1451_s10  ;;  %p1457_p12 = scmp.lt.s32.totalorder %s1451_s10, %s1451_s10 }
  0x55   :  { %612 = vmatpush1.bf16.msra.mxu0 %v1292_v28  ;;  %v1370_v28 = vld [vmem:[#allocation7] sm:$0xff]   ;;  %v1372_v30 = vld [vmem:[#allocation7 + $0x8] sm:$0xff]   ;;  %v1376_v34 = vld [vmem:[#allocation7 + $0x18] sm:$0xff]  }
  0x56   :  { %613 = vmatprep.subr.bf16.mxu0 %v1295_v31  ;;  %v1373_v31 = vld [vmem:[#allocation7 + $0x50] sm:$0xff]   ;;  %p1458_p13 = por %p1457_p12, %p1456_p11 }
  0x57   :  { %1182 = vmatpush3.bf16.msra.mxu1 %v1299_v33  ;;  %v1375_v33 = vld [vmem:[#allocation7 + $0x58] sm:$0xff]  }
  0x58   :  { %719 = vmatprep.subr.bf16.mxu1 %v1486_v40  ;;  %p1459_p0 = pnand %p1458_p13, %p1452_p10 }
  0x59   :  { %614 = vmatpush1.bf16.msra.mxu0 %v1297_v35  ;;  %v1377_v35 = vld [vmem:[#allocation7 + $0x60] sm:$0xff]  }
  0x5a   :  { %615 = vmatprep.subr.bf16.mxu0 %v1300_v36  ;;  %712 = vmatmul.mubr.bf16.vlgmr.msra.gmra.mrb[0].mxu1 %v1556_v37  ;;  %v1378_v36 = vld [vmem:[#allocation7 + $0x20] sm:$0xff]  }
  0x5b   :  { %720 = vmatpush1.bf16.msra.mxu1 %v1305_v38  ;;  %1141 = vmatprep.mubr.msk.bf16.mxu1 %vm593_vm0, %v1064_v54  ;;  %v1380_v38 = vld [vmem:[#allocation7 + $0x28] sm:$0xff]  }
  0x5c   :  { %721 = vmatprep.subr.bf16.mxu1 %v1486_v40 }
  0x5d   :  { %616 = vmatpush1.bf16.msra.mxu0 %v1302_v39  ;;  %v1381_v39 = vld [vmem:[#allocation7 + $0x70] sm:$0xff]  }
  0x5e   :  { %617 = vmatprep.subr.bf16.mxu0 %v1306_v41  ;;  %v1383_v41 = vld [vmem:[#allocation7 + $0x78] sm:$0xff]  }
  0x5f   :  { %722 = vmatpush1.bf16.msra.mxu1 %v1309_v42  ;;  %v1384_v42 = vld [vmem:[#allocation7 + $0x38] sm:$0xff]  }
  0x60   :  { %723 = vmatprep.subr.bf16.mxu1 %v1486_v40 }
  0x61   :  { %618 = vmatpush1.bf16.msra.mxu0 %v1308_v43 }
  0x62   :  { %619 = vmatprep.subr.bf16.mxu0 %v1310_v44 }
  0x63   :  { %724 = vmatpush1.bf16.msra.mxu1 %v1313_v45 }
  0x64   :  { %725 = vmatprep.subr.bf16.mxu1 %v1486_v40 }
  0x65   :  { %620 = vmatpush1.bf16.msra.mxu0 %v1312_v46 }
  0x66   :  { %621 = vmatprep.subr.bf16.mxu0 %v1314_v47 }
  0x67   :  { %726 = vmatpush1.bf16.msra.mxu1 %v1317_v48  ;;  %v165_v48 = vlaneseq }
  0x68   :  { %727 = vmatprep.subr.bf16.mxu1 %v1486_v40 }
  0x69   :  { %622 = vmatpush1.bf16.msra.mxu0 %v1316_v49  ;;  %v166_v49 = vshrl.u32 %v165_v48, 7 }
  0x6a   :  { %623 = vmatprep.subr.bf16.mxu0 %v1318_v50 }
  0x6b   :  { %728 = vmatpush1.bf16.msra.mxu1 %v1321_v51  ;;  %v175_v50 = vsub.s32 2, %v166_v49  ;;  %v163_v51 = vld [vmem:[%s1591_s2] sm:$0x7] }
  0x6c   :  { %729 = vmatprep.subr.bf16.mxu1 %v1486_v40 }
  0x6d   :  { %624 = vmatpush1.bf16.msra.mxu0 %v1320_v53  ;;  %v176_v52 = vrot.slane %v163_v51, %v175_v50 }
  0x6e   :  { %625 = vmatprep.subr.bf16.mxu0 %v1322_v55 }
  0x6f   :  { %730 = vmatpush1.bf16.msra.mxu1 %v1325_v56 }
  0x70   :  { %731 = vmatprep.subr.bf16.mxu1 %v1486_v40 }
  0x71   :  { %626 = vmatpush1.bf16.msra.mxu0 %v1324_v57 }
  0x72   :  { %627 = vmatprep.subr.bf16.mxu0 %v1326_v58 }
  0x73   :  { %732 = vmatpush1.bf16.msra.mxu1 %v1329_v59 }
  0x74   :  { %733 = vmatprep.subr.bf16.mxu1 %v1486_v40 }
  0x75   :  { %628 = vmatpush1.bf16.msra.mxu0 %v1328_v60 }
  0x76   :  { %638 = vmatprep.subr.bf16.mxu0 %v1332_v61  ;;  %v167_v61 = vsub.s32 0, %v166_v49 }
  0x77   :  { %734 = vmatpush1.bf16.msra.mxu1 %v1333_v63 }
  0x78   :  { %630 = vmatmul.mubr.bf16.vlgmr.msra.gmra.mrb[0].mxu0 %v1556_v37  ;;  %735 = vmatprep.subr.bf16.mxu1 %v1486_v40  ;;  %v1379_v37 = vld [vmem:[#allocation7 + $0x68] sm:$0xff]   ;;  %v1382_v40 = vld [vmem:[#allocation7 + $0x30] sm:$0xff]   ;;  %v168_v63 = vrot.slane %v163_v51, %v167_v61 }
  0x79   :  { %639 = vmatpush1.bf16.msra.mxu0 %v1330_v62  ;;  %1140 = vmatprep.mubr.msk.bf16.mxu0 %vm593_vm0, %v1064_v54  ;;  %v171_v62 = vsub.s32 1, %v166_v49 }
  0x7a   :  { %640 = vmatprep.subr.bf16.mxu0 %v1336_v0 }
  0x7b   :  { %736 = vmatpush1.bf16.msra.mxu1 %v1337_v1  ;;  %v172_v0 = vrot.slane %v163_v51, %v171_v62 }
  0x7c   :  { %1189 = vmatprep.subr.bf16.mxu1 %v1368_v26 }
  0x7d   :  { %641 = vmatpush1.bf16.msra.mxu0 %v1334_v2 }
  0x7e   :  { %642 = vmatprep.subr.bf16.mxu0 %v1340_v3  ;;  %752 = vmatmul.mubr.bf16.vlgmr.msra.gmra.mrb[4].mxu1 %v1063_v5 }
  0x7f   :  { %1190 = vmatpush3.bf16.msra.mxu1 %v1370_v28 }
  0x80   :  { %1191 = vmatprep.subr.bf16.mxu1 %v1371_v29 }
  0x81   :  { %643 = vmatpush1.bf16.msra.mxu0 %v1338_v4 }
  0x82   :  { %644 = vmatprep.subr.bf16.mxu0 %v1345_v6 }
  0x83   :  { %1192 = vmatpush3.bf16.msra.mxu1 %v1372_v30 }
  0x84   :  { %1193 = vmatprep.subr.bf16.mxu1 %v1373_v31 }
  0x85   :  { %645 = vmatpush1.bf16.msra.mxu0 %v1343_v7 }
  0x86   :  { %646 = vmatprep.subr.bf16.mxu0 %v1348_v8 }
  0x87   :  { %1194 = vmatpush3.bf16.msra.mxu1 %v1374_v32 }
  0x88   :  { %1195 = vmatprep.subr.bf16.mxu1 %v1375_v33 }
  0x89   :  { %647 = vmatpush1.bf16.msra.mxu0 %v1346_v9 }
  0x8a   :  { %648 = vmatprep.subr.bf16.mxu0 %v1351_v10 }
  0x8b   :  { %1196 = vmatpush3.bf16.msra.mxu1 %v1376_v34 }
  0x8c   :  { %1197 = vmatprep.subr.bf16.mxu1 %v1377_v35 }
  0x8d   :  { %649 = vmatpush1.bf16.msra.mxu0 %v1349_v11 }
  0x8e   :  { %650 = vmatprep.subr.bf16.mxu0 %v1354_v12 }
  0x8f   :  { %1198 = vmatpush3.bf16.msra.mxu1 %v1378_v36 }
  0x90   :  { %1199 = vmatprep.subr.bf16.mxu1 %v1379_v37 }
  0x91   :  { %651 = vmatpush1.bf16.msra.mxu0 %v1352_v13 }
  0x92   :  { %652 = vmatprep.subr.bf16.mxu0 %v1357_v14 }
  0x93   :  { %1200 = vmatpush3.bf16.msra.mxu1 %v1380_v38 }
  0x94   :  { %1201 = vmatprep.subr.bf16.mxu1 %v1381_v39 }
  0x95   :  { %653 = vmatpush1.bf16.msra.mxu0 %v1355_v15 }
  0x96   :  { %654 = vmatprep.subr.bf16.mxu0 %v1360_v16  ;;  %v1142_v16 = vld [vmem:[%s1593_s4] ss:$0 sm:$0xff] }
  0x97   :  { %1202 = vmatpush3.bf16.msra.mxu1 %v1382_v40 }
  0x98   :  { %1203 = vmatprep.subr.bf16.mxu1 %v1383_v41 }
  0x99   :  { %655 = vmatpush1.bf16.msra.mxu0 %v1358_v17 }
  0x9a   :  { %1220 = vmatprep.subr.bf16.mxu0 %v1487_v19 }
  0x9b   :  { %1204 = vmatpush3.bf16.msra.mxu1 %v1384_v42 }
  0x9c   :  { %671 = vmatmul.mubr.bf16.vlgmr.msra.gmra.mrb[0].mxu0 %v1063_v5 }
  0x9d   :  { %1221 = vmatpush3.bf16.msra.mxu0 %v1361_v18  ;;  %1236 = vmatprep.mubr.msk.bf16.mxu0 %vm1488_vm1, %v1487_v19 }
  0x9e   :  { %1222 = vmatprep.subr.bf16.mxu0 %v1487_v19 }
  0xa1   :  { %1223 = vmatpush3.bf16.msra.mxu0 %v1362_v20 }
  0xa2   :  { %1224 = vmatprep.subr.bf16.mxu0 %v1487_v19 }
  0xa5   :  { %1225 = vmatpush3.bf16.msra.mxu0 %v1363_v21 }
  0xa6   :  { %1226 = vmatprep.subr.bf16.mxu0 %v1487_v19 }
  0xa9   :  { %1227 = vmatpush3.bf16.msra.mxu0 %v1364_v22 }
  0xaa   :  { %1228 = vmatprep.subr.bf16.mxu0 %v1487_v19 }
  0xad   :  { %1229 = vmatpush3.bf16.msra.mxu0 %v1365_v23 }
  0xae   :  { %1230 = vmatprep.subr.bf16.mxu0 %v1487_v19 }
  0xb1   :  { %1231 = vmatpush3.bf16.msra.mxu0 %v1366_v24 }
  0xb2   :  { %1232 = vmatprep.subr.bf16.mxu0 %v1487_v19 }
  0xb5   :  { %1233 = vmatpush3.bf16.msra.mxu0 %v1367_v25 }
  0xb6   :  { %1234 = vmatprep.subr.bf16.mxu0 %v1487_v19 }
  0xb9   :  { %1235 = vmatpush3.bf16.msra.mxu0 %v1369_v27 }
 0x12d   :  { %v1183_v43 = vpop.f32.mrb[0].mxu1 }
 0x12e   :  { %v1184_v44 = vpop.f32.mrb[1].mxu1 }
 0x12f   :  { %v1185_v45 = vadd.f32 %v1184_v44, %v1183_v43  ;;  %v1186_v46 = vpop.f32.mrb[2].mxu1 }
 0x130   :  { %v1187_v47 = vpop.f32.mrb[3].mxu1 }
 0x131   :  { %v714_v53 = vadd.f32 %v1185_v45, %v176_v52 }
 0x151   :  { %v753_v54 = vpop.f32.mrb[4].mxu1 }
 0x152   :  { %v754_v55 = vadd.f32 %v753_v54, %v714_v53  ;;  %v755_v56 = vpop.f32.mrb[5].mxu1 }
 0x153   :  { %v756_v57 = vpop.f32.mrb[6].mxu1 }
 0x154   :  { %v761_v58 = vmax.f32 %v754_v55, 0.0  ;;  %v757_v59 = vpop.f32.mrb[7].mxu1 }
 0x156   :  { %v764_v60 = vpack.c.bf16 %v761_v58, %v761_v58 }
 0x158   :  { %1237 = vmatmul.mubr.bf16.vlgmr.msra.gmra.mrb[4].mxu0 %v764_v60 }
 0x16f   :  { %v672_v1 = vpop.f32.mrb[0].mxu0 }
 0x170   :  { %v1240_v2 = vadd.f32 %v672_v1, %v168_v63  ;;  %v674_v3 = vpop.f32.mrb[1].mxu0 }
 0x171   :  { %v1241_v4 = vadd.f32 %v674_v3, %v172_v0  ;;  %v676_v5 = vpop.f32.mrb[2].mxu0 }
 0x172   :  { %v759_v6 = vmax.f32 %v1240_v2, 0.0  ;;  %v677_v7 = vpop.f32.mrb[3].mxu0 }
 0x173   :  { %v760_v8 = vmax.f32 %v1241_v4, 0.0 }
 0x174   :  { %v762_v10 = vpack.c.bf16 %v759_v6, %v759_v6 }
 0x175   :  { %v763_v9 = vpack.c.bf16 %v760_v8, %v760_v8 }
 0x177   :  { %996 = vmatprep.mubr.bf16.mxu1 %v763_v9 }
 0x178   :  { %997 = vmatmul.mubr.bf16.vlgmr.msra.gmra.mrb[8].mxu1 %v762_v10 }
 0x22b   :  { %v1038_v11 = vpop.f32.mrb[4].mxu0 }
 0x22c   :  { %v1238_v12 = vpop.f32.mrb[5].mxu0 }
 0x22d   :  { %v1041_v13 = vpop.f32.mrb[6].mxu0 }
 0x22e   :  { %v1239_v14 = vpop.f32.mrb[7].mxu0 }
 0x24b   :  { %v1205_v15 = vpop.f32.mrb[8].mxu1 }
 0x24c   :  { %v1206_v17 = vpop.f32.mrb[9].mxu1 }
 0x24d   :  { %v1207_v18 = vadd.f32 %v1206_v17, %v1205_v15  ;;  %v1208_v19 = vpop.f32.mrb[10].mxu1 }
 0x24e   :  { %v1209_v20 = vpop.f32.mrb[11].mxu1 }
 0x24f   :  { %v999_v21 = vadd.f32 %v1207_v18, %v1142_v16 }
 0x251   :  { %v1039_v22 = vadd.f32 %v1038_v11, %v999_v21 }
 0x253   :  { %1044 = vst [vmem:[#allocation8] sm:$0xff] %v1039_v22 }
 0x254   :  { %1462 = shalt.err (!%p1459_p0)
}
 0x255   :  { %s1463_s4 = scalar_lea.hbm %s1594_s5, 128 }
 0x256   :  { %p1464_p1 = scmp.ne.s32.totalorder %s1594_s5, %s1463_s4  ;;  %p1467_p2 = scmp.lt.u32.totalorder %s1463_s4, %s1594_s5 }
 0x258   :  { %p1469_p3 = pnand %p1467_p2, %p1464_p1 }
 0x25a   :  { %1472 = shalt.err (!%p1469_p3)
}
 0x25b   :  { %1054 = dma.vmem_to_hbm [thread:$0]  %s1052_s9, 128, %s1594_s5, [#allocation4]  }
 0x25c   :  { %1477 = dma.done.wait [#allocation4], 128  }
 0x25d   :  { %1478 = vsyncadd [#allocation4], 4294967168 }
 0x25e   :  { %1058 = vsyncpa [#allocation3], 1 }
 0x25f   :  { %1059 = vsyncpa [#allocation6], 1 }
 0x260   :  { %1060 = vsyncpa [#allocation4], 1 }

</bundles_post_ra>
